<compile_context>
chip_gen: v7x
topology: tpu7x:2x2x1
jax: 0.10.0
libtpu: 0.0.40
codegen_flags: <defaults>
</compile_context>

<pallas_src>
import jax
import jax.numpy as jnp
from jax.experimental import pallas as pl
from jax.experimental.pallas import tpu as pltpu


def _fused_linear_kernel(x_ref, wt_ref, b_ref, o_ref):
    """o = x @ wt + b, with K unrolled as VPU FMAs (no MXU).

    x_ref : (B, K)  f32   input (prologue already folded into wt/b)
    wt_ref: (K, N)  f32   pre-scaled (2*W) and pre-transposed weight
    b_ref : (1, N)  f32   folded bias  b + 2*sum(W, axis=1)
    o_ref : (B, N)  f32
    """
    x = x_ref[...]
    wt = wt_ref[...]
    k_dim = x_ref.shape[1]

    # Unrolled outer-product accumulate: acc[b, n] += x[b, k] * wt[k, n]
    acc = x[:, 0:1] * wt[0:1, :]
    for k in range(1, k_dim):
        acc = acc + x[:, k : k + 1] * wt[k : k + 1, :]

    o_ref[...] = (acc + b_ref[...]).astype(o_ref.dtype)


def fused_model(x, w, b):
    """Forward pass of the PyTorch Model with a single fused Pallas call.

    x: (B, F_in) f32
    w: (F_out, F_in) f32   (PyTorch nn.Linear weight layout)
    b: (F_out,) f32
    """
    B, F_in = x.shape
    F_out = w.shape[0]
    assert w.shape == (F_out, F_in)
    assert b.shape == (F_out,)

    # Fold the elementwise prologue ((x + 1) * 2) into the Linear params.
    # With static inference weights this is constant-folded by XLA; either
    # way it removes 2 VALU ops per vreg from the kernel body.
    wt_eff = (2.0 * w).T                              # (F_in, F_out), [in, out]
    b_eff = (b + 2.0 * jnp.sum(w, axis=1)).reshape(1, F_out)

    itemsize = jnp.dtype(x.dtype).itemsize
    cost = pl.CostEstimate(
        flops=2 * B * F_in * F_out + B * F_out,
        transcendentals=0,
        bytes_accessed=itemsize
        * (x.size + wt_eff.size + b_eff.size + B * F_out),
    )

    return pl.pallas_call(
        _fused_linear_kernel,
        out_shape=jax.ShapeDtypeStruct((B, F_out), x.dtype),
        in_specs=[
            pl.BlockSpec(memory_space=pltpu.MemorySpace.VMEM),
            pl.BlockSpec(memory_space=pltpu.MemorySpace.VMEM),
            pl.BlockSpec(memory_space=pltpu.MemorySpace.VMEM),
        ],
        out_specs=pl.BlockSpec(memory_space=pltpu.MemorySpace.VMEM),
        cost_estimate=cost,
    )(x, wt_eff, b_eff)


if __name__ == "__main__":
    key = jax.random.PRNGKey(0)
    kx, kw, kb = jax.random.split(key, 3)

    # Matches the module: x = torch.randn(2, 2); Linear(2, 2)
    x = jax.random.normal(kx, (2, 2), dtype=jnp.float32)
    w = jax.random.normal(kw, (2, 2), dtype=jnp.float32) * 0.5   # [out, in]
    b = jax.random.normal(kb, (2,), dtype=jnp.float32) * 0.1     # [out]

    out = fused_model(x, w, b)
    jax.block_until_ready(out)

    # Reference: the original (un-folded) module semantics.
    ref = ((x + 1.0) * 2.0) @ w.T + b
    assert jnp.allclose(out, ref, atol=1e-5), (out, ref)

    print("KERNEL_OK")
</pallas_src>

<mosaic_0001>
module attributes {stable_mosaic.version = 11 : i64} {
  func.func @_fused_linear_kernel(%arg0: memref<2x2xf32, #tpu.memory_space<vmem>>, %arg1: memref<2x2xf32, #tpu.memory_space<vmem>>, %arg2: memref<1x2xf32, #tpu.memory_space<vmem>>, %arg3: memref<2x2xf32, #tpu.memory_space<vmem>>) attributes {dimension_semantics = [], scalar_prefetch = 0 : i64, scratch_operands = 0 : i64, tpu.core_type = #tpu.core_type<tc>} {
    %c0 = arith.constant 0 : index
    %c0_0 = arith.constant 0 : index
    %0 = vector.load %arg0[%c0, %c0_0] : memref<2x2xf32, #tpu.memory_space<vmem>>, vector<2x2xf32>
    %c0_1 = arith.constant 0 : index
    %c0_2 = arith.constant 0 : index
    %1 = vector.load %arg1[%c0_1, %c0_2] : memref<2x2xf32, #tpu.memory_space<vmem>>, vector<2x2xf32>
    %2 = vector.extract_strided_slice %0 {offsets = [0, 0], sizes = [2, 1], strides = [1, 1]} : vector<2x2xf32> to vector<2x1xf32>
    %3 = vector.extract_strided_slice %1 {offsets = [0, 0], sizes = [1, 2], strides = [1, 1]} : vector<2x2xf32> to vector<1x2xf32>
    %4 = vector.broadcast %2 : vector<2x1xf32> to vector<2x2xf32>
    %5 = vector.broadcast %3 : vector<1x2xf32> to vector<2x2xf32>
    %6 = arith.mulf %4, %5 : vector<2x2xf32>
    %7 = vector.extract_strided_slice %0 {offsets = [0, 1], sizes = [2, 1], strides = [1, 1]} : vector<2x2xf32> to vector<2x1xf32>
    %8 = vector.extract_strided_slice %1 {offsets = [1, 0], sizes = [1, 2], strides = [1, 1]} : vector<2x2xf32> to vector<1x2xf32>
    %9 = vector.broadcast %7 : vector<2x1xf32> to vector<2x2xf32>
    %10 = vector.broadcast %8 : vector<1x2xf32> to vector<2x2xf32>
    %11 = arith.mulf %9, %10 : vector<2x2xf32>
    %12 = arith.addf %6, %11 : vector<2x2xf32>
    %c0_3 = arith.constant 0 : index
    %c0_4 = arith.constant 0 : index
    %13 = vector.load %arg2[%c0_3, %c0_4] : memref<1x2xf32, #tpu.memory_space<vmem>>, vector<1x2xf32>
    %14 = vector.broadcast %13 : vector<1x2xf32> to vector<2x2xf32>
    %15 = arith.addf %12, %14 : vector<2x2xf32>
    %c0_5 = arith.constant 0 : index
    %c0_6 = arith.constant 0 : index
    %16 = vector.load %arg3[%c0_5, %c0_6] : memref<2x2xf32, #tpu.memory_space<vmem>>, vector<2x2xf32>
    tpu.vector_store %arg3[%c0_5, %c0_6], %15 {strides = array<i32>} : memref<2x2xf32, #tpu.memory_space<vmem>>, vector<2x2xf32>,
    return
  }
}

</mosaic_0001>

<bundles_post_ra>
// kernel: tpu_custom_call.1
= control target key start
LH: loop header
LB: loop body
LE: loop exit
PB: predicated region body
PF: predicated region fallthrough
CT: control target
= control target key end

     0   :  { %8 = vsyncpa [#allocation3], 0  ;;  %s183_s0 = inlined_call_operand.hbm [shape: f32[2,2], index: 0, kind: input, shape index: {}]   ;;  %s184_s1 = inlined_call_operand.vmem [shape: f32[2,2], index: 1, kind: input, shape index: {}]   ;;  %s185_s2 = inlined_call_operand.vmem [shape: f32[1,2], index: 2, kind: input, shape index: {}]   ;;  %s186_s3 = inlined_call_operand.hbm [shape: f32[2,2], index: 3, kind: output, shape index: {}]  }
   0x1   :  { %9 = vsyncpa [#allocation4], 0  ;;  %s129_s12 = smov [#allocation2]   ;;  %s81_s16 = scalar_lea.hbm %s183_s0, 32 }
   0x2   :  { %s16_s13 = sshll.u32 %s129_s12, 4  ;;  %p82_p0 = scmp.ne.s32.totalorder %s183_s0, %s81_s16  ;;  %s17_s13 = int_to_ptr.vmem [resolvable:$true] %s16_s13 }
   0x3   :  { %p85_p1 = scmp.lt.u32.totalorder %s81_s16, %s183_s0 }
   0x5   :  { %p87_p2 = pnand %p85_p1, %p82_p0 }
   0x7   :  { %90 = shalt.err (!%p87_p2)
}
   0x8   :  { %s91_s21 = scalar_lea.vmem %s17_s13, 32  ;;  %p96_p4 = scmp.lt.s32.totalorder %s17_s13, %s17_s13 }
   0x9   :  { %p92_p3 = scmp.ne.s32.totalorder %s17_s13, %s91_s21  ;;  %p97_p5 = scmp.lt.s32.totalorder %s91_s21, %s91_s21 }
   0xb   :  { %p98_p6 = por %p97_p5, %p96_p4 }
   0xd   :  { %p99_p7 = pnand %p98_p6, %p92_p3 }
   0xf   :  { %102 = shalt.err (!%p99_p7)
}
  0x10   :  { %19 = dma.hbm_to_vmem [thread:$0]  %s183_s0, 32, %s17_s13, [#allocation3]  }
  0x11   :  { %125 = dma.done.wait [#allocation3], 32  }
  0x12   :  { %126 = vsyncadd [#allocation3], 4294967264  ;;  %v130_v0 = vmov 0   ;;  %v27_v1 = vld [vmem:[#allocation2] sm:$0x3]  ;;  %v131_v2 = vmov 1   ;;  %v34_v3 = vlaneseq }
  0x13   :  { %79 = vset.pattern.permute.xlu0 %v130_v0  ;;  %v28_v7 = vld [vmem:[%s184_s1] sm:$0x3]  ;;  %s132_s27 = smov [#allocation5]   ;;  %vm57_vm0 = vcmask 9216  }
  0x14   :  { %31 = vperm.xlu0 %79, %v27_v1   ;;  %v35_v4 = vshrl.u32 %v34_v3, 7  ;;  %v74_v14 = vld [vmem:[%s185_s2] ss:$0 sm:$0xff]  ;;  %s65_s28 = sshll.u32 %s132_s27, 4  ;;  %s66_s28 = int_to_ptr.vmem [resolvable:$true] %s65_s28 }
  0x15   :  { %s103_s29 = scalar_lea.vmem %s66_s28, 32  ;;  %p108_p9 = scmp.lt.s32.totalorder %s66_s28, %s66_s28 }
  0x16   :  { %v36_v5 = vsub.s32 0, %v35_v4  ;;  %v45_v6 = vsub.s32 1, %v35_v4  ;;  %p104_p8 = scmp.ne.s32.totalorder %s66_s28, %s103_s29  ;;  %p109_p10 = scmp.lt.s32.totalorder %s103_s29, %s103_s29 }
  0x18   :  { %80 = vset.pattern.permute.xlu0 %v131_v2  ;;  %v37_v9 = vrot.slane %v28_v7, %v36_v5  ;;  %v46_v10 = vrot.slane %v28_v7, %v45_v6  ;;  %p110_p11 = por %p109_p10, %p108_p9 }
  0x19   :  { %40 = vperm.xlu0 %80, %v27_v1  }
  0x1a   :  { %p111_p12 = pnand %p110_p11, %p104_p8 }
  0x93   :  { %v32_v8 = vpop.permute.xlu0 %31 }
  0x94   :  { %v38_v12 = vmul.f32 %v37_v9, %v32_v8 }
  0x98   :  { %v41_v11 = vpop.permute.xlu0 %40 }
  0x99   :  { %v47_v13 = vmul.f32 %v46_v10, %v41_v11 }
  0x9b   :  { %v48_v15 = vadd.f32 %v47_v13, %v38_v12 }
  0x9d   :  { %v56_v16 = vadd.f32 %v74_v14, %v48_v15 }
  0x9f   :  { %58 = vst.msk [vmem:[#allocation5] sm:$0x3] %vm57_vm0, %v56_v16 }
  0xa0   :  { %114 = shalt.err (!%p111_p12)
}
  0xa1   :  { %s115_s4 = scalar_lea.hbm %s186_s3, 32 }
  0xa2   :  { %p116_p13 = scmp.ne.s32.totalorder %s186_s3, %s115_s4  ;;  %p119_p0 = scmp.lt.u32.totalorder %s115_s4, %s186_s3 }
  0xa4   :  { %p121_p1 = pnand %p119_p0, %p116_p13 }
  0xa6   :  { %124 = shalt.err (!%p121_p1)
}
  0xa7   :  { %68 = dma.vmem_to_hbm [thread:$0]  %s66_s28, 32, %s186_s3, [#allocation4]  }
  0xa8   :  { %127 = dma.done.wait [#allocation4], 32  }
  0xa9   :  { %128 = vsyncadd [#allocation4], 4294967264 }
  0xaa   :  { %72 = vsyncpa [#allocation3], 1 }
  0xab   :  { %73 = vsyncpa [#allocation4], 1 }

</bundles_post_ra>
